<compile_context>
chip_gen: v6e
topology: v6e:2x2x1
jax: 0.10.0
libtpu: 0.0.40
codegen_flags: <defaults>
</compile_context>

<pallas_src>
import functools

import jax
import jax.numpy as jnp
from jax.experimental import pallas as pl
from jax.experimental.pallas import tpu as pltpu

# ----------------------------- configuration --------------------------------
LAYERS = 3
BLOCKS = 1
KERNEL_SIZE = 2
CLASSES = 16          # in/out classes of the WaveNet
RESIDUAL_CH = 16
DILATION_CH = 16
SKIP_CH = 16
END_CH = 16
FLIP_DECODER = True   # only flip_decoder=True (the module default) is implemented

DILATIONS = tuple(2 ** l for _ in range(BLOCKS) for l in range(LAYERS))   # (1, 2, 4)
N_LAYERS = BLOCKS * LAYERS
RECEPTIVE_FIELD = 1 + (KERNEL_SIZE - 1) * sum(DILATIONS)                  # 8


def _round_up(x, m):
    return (x + m - 1) // m * m


# ------------------------------- kernel --------------------------------------
def _wavenet_kernel(x_ref, wlo_ref, whi_ref, wsr_ref, we1_ref, be1_ref,
                    we2_ref, be2_ref, out_ref, *, seq_len, t_pad, dilations):
    """WaveNet stack in forward-time coordinates (flips absorbed).

    x_ref    : (nb, seq_len, R)  start-conv output (unflipped, unpadded)
    wlo/whi  : (L, R, 2*DC)      fused [f|g] gate weights for the lo / hi tap
    wsr      : (L, DC, SC+RC)    fused [skip|residual] 1x1 weights
    out_ref  : (nb, seq_len, CLASSES)
    """
    nb = x_ref.shape[0]
    m = nb * t_pad

    dot = functools.partial(jnp.dot, preferred_element_type=jnp.float32)

    # In-register right-pad of the time axis to t_pad: covers the receptive
    # field and rounds the sublane extent up to a multiple of 8.  No VMEM
    # scratch, no full-block zero fill, no read-back.
    pad = jnp.zeros((nb, t_pad - seq_len, RESIDUAL_CH), x_ref.dtype)
    x = jnp.concatenate([x_ref[...], pad], axis=1)              # (nb, t_pad, R)
    # 8-aligned leading-dim collapse -> free relayout; all dots are 2-D.
    x = x.reshape(m, RESIDUAL_CH)                               # (m, R)

    skip = None
    for i, d in enumerate(dilations):
        lo = x                                                  # tap x[t]
        # Tap x[t + d]: static shift by d.  The d zero tail rows (and, when
        # nb > 1, the rows that peek into the next batch element) only feed
        # output positions >= seq_len + 1, which are discarded.
        hi = jnp.concatenate(
            [x[d:, :], jnp.zeros((d, RESIDUAL_CH), x.dtype)], axis=0)
        # TODO(synk): fuse lo|hi into one K=32 gate dot (lane roll + select)
        # once a bundle dump shows the extra MXU push / VPU add binds.
        pre = dot(lo, wlo_ref[i]) + dot(hi, whi_ref[i])         # (m, 2*DC) f|g
        z = jnp.tanh(pre[:, :DILATION_CH]) * jax.nn.sigmoid(pre[:, DILATION_CH:])
        # TODO(synk): on v6e/v7x cast `pre` to bf16 for tanh/sigmoid once the
        # EUP binds at production seq_len (keep f32 here for v5e + tolerance).
        sr = dot(z, wsr_ref[i])                                 # (m, SC+RC)
        s = sr[:, :SKIP_CH]
        skip = s if skip is None else skip + s
        x = sr[:, SKIP_CH:] + lo                                # residual 1x1 + lo

    h = jnp.maximum(skip, 0.0)
    h = jnp.maximum(dot(h, we1_ref[...]) + be1_ref[...], 0.0)
    out = dot(h, we2_ref[...]) + be2_ref[...]                   # (m, CLASSES)
    out = out.reshape(nb, t_pad, CLASSES)
    # Forward-time coords: keep the FIRST seq_len steps, no flip needed.
    out_ref[...] = out[:, :seq_len, :].astype(out_ref.dtype)


# ------------------------------- wrapper --------------------------------------
def fuse_params(p):
    """Pre-concatenate the per-layer weights once (outside the kernel).

    Tap swap from absorbing the time flip: in forward-time coordinates the
    'lo' tap multiplies kernel position 1 and the 'hi' tap kernel position 0.
    """
    wlo = jnp.concatenate([p["wf"][:, 1], p["wg"][:, 1]], axis=-1)   # (L, R, 2*DC)
    whi = jnp.concatenate([p["wf"][:, 0], p["wg"][:, 0]], axis=-1)   # (L, R, 2*DC)
    wsr = jnp.concatenate([p["wskip"], p["wres"]], axis=-1)          # (L, DC, SC+RC)
    return dict(wstart=p["wstart"], wlo=wlo, whi=whi, wsr=wsr,
                we1=p["we1"], be1=p["be1"], we2=p["we2"], be2=p["be2"])


def wavenet_decoder_forward(x_ncl, fused):
    """x_ncl: one-hot (N, CLASSES, L) in PyTorch NCL layout. Returns NCL logits."""
    n, classes, seq_len = x_ncl.shape
    assert classes == CLASSES
    # Fixed, 8-aligned padded time extent used through every layer.
    t_pad = _round_up(seq_len + RECEPTIVE_FIELD, 8)

    # Single wrapper op on the input: NCL->NTC transpose fused with the start
    # 1x1 conv (no flip, no pad — both handled algebraically / in-kernel).
    x0 = jnp.einsum("ncl,cr->nlr", x_ncl, fused["wstart"])           # (n, L, R)

    # Batch-tile grid marked "parallel": feeds both v7x TensorCores, costs one
    # extra tiny grid step on v5e/v6e.
    n_tiles = 2 if (n >= 2 and n % 2 == 0) else 1
    bt = n // n_tiles

    def weight_spec(shape):
        nd = len(shape)
        return pl.BlockSpec(tuple(shape), lambda b, _nd=nd: (0,) * _nd)

    kernel = functools.partial(_wavenet_kernel, seq_len=seq_len, t_pad=t_pad,
                               dilations=DILATIONS)

    out_btc = pl.pallas_call(
        kernel,
        out_shape=jax.ShapeDtypeStruct((n, seq_len, CLASSES), jnp.float32),
        grid=(n_tiles,),
        in_specs=[
            pl.BlockSpec((bt, seq_len, RESIDUAL_CH), lambda b: (b, 0, 0)),
            weight_spec(fused["wlo"].shape),
            weight_spec(fused["whi"].shape),
            weight_spec(fused["wsr"].shape),
            weight_spec(fused["we1"].shape),
            weight_spec(fused["be1"].shape),
            weight_spec(fused["we2"].shape),
            weight_spec(fused["be2"].shape),
        ],
        out_specs=pl.BlockSpec((bt, seq_len, CLASSES), lambda b: (b, 0, 0)),
        compiler_params=pltpu.CompilerParams(dimension_semantics=("parallel",)),
    )(x0, fused["wlo"], fused["whi"], fused["wsr"],
      fused["we1"], fused["be1"], fused["we2"], fused["be2"])

    # TODO(synk): at production seq_len, add a time-tiled grid axis with a
    # RECEPTIVE_FIELD halo and emit a lane-dense NCL (time-on-lane) output
    # straight from the kernel instead of this small wrapper transpose.
    return jnp.transpose(out_btc, (0, 2, 1))


# --------------------------- params & reference -------------------------------
def init_params(key):
    ks = jax.random.split(key, 9)

    def w(k, shape, fan_in):
        return jax.random.normal(k, shape, jnp.float32) * (1.0 / jnp.sqrt(fan_in))

    return dict(
        wstart=w(ks[0], (CLASSES, RESIDUAL_CH), CLASSES),
        wf=w(ks[1], (N_LAYERS, KERNEL_SIZE, RESIDUAL_CH, DILATION_CH),
             RESIDUAL_CH * KERNEL_SIZE),
        wg=w(ks[2], (N_LAYERS, KERNEL_SIZE, RESIDUAL_CH, DILATION_CH),
             RESIDUAL_CH * KERNEL_SIZE),
        wskip=w(ks[3], (N_LAYERS, DILATION_CH, SKIP_CH), DILATION_CH),
        wres=w(ks[4], (N_LAYERS, DILATION_CH, RESIDUAL_CH), DILATION_CH),
        we1=w(ks[5], (SKIP_CH, END_CH), SKIP_CH),
        be1=w(ks[6], (1, END_CH), END_CH),
        we2=w(ks[7], (END_CH, CLASSES), END_CH),
        be2=w(ks[8], (1, CLASSES), CLASSES),
    )


def wavenet_decoder_reference(x_ncl, p, *, flip_decoder=FLIP_DECODER):
    """Faithful flip/left-pad formulation (mirrors the PyTorch module)."""
    n, _, seq_len = x_ncl.shape
    if flip_decoder:
        x_ncl = jnp.flip(x_ncl, axis=-1)
    x = jnp.pad(x_ncl, ((0, 0), (0, 0), (RECEPTIVE_FIELD, 0)))
    x = jnp.transpose(x, (0, 2, 1)).astype(jnp.float32)
    x = x @ p["wstart"]
    t_final = seq_len + 1
    skip = jnp.zeros((n, t_final, SKIP_CH), jnp.float32)
    for i, d in enumerate(DILATIONS):
        tn = x.shape[1] - d
        lo, hi = x[:, :tn], x[:, d:]
        z = jnp.tanh(lo @ p["wf"][i, 0] + hi @ p["wf"][i, 1]) * \
            jax.nn.sigmoid(lo @ p["wg"][i, 0] + hi @ p["wg"][i, 1])
        s = z @ p["wskip"][i]
        skip = skip + s[:, tn - t_final:]
        x = z @ p["wres"][i] + hi
    h = jnp.maximum(skip, 0.0)
    h = jnp.maximum(h @ p["we1"] + p["be1"], 0.0)
    out = h @ p["we2"] + p["be2"]
    out = out[:, t_final - seq_len:]
    out = jnp.transpose(out, (0, 2, 1))
    if flip_decoder:
        out = jnp.flip(out, axis=-1)
    return out


# --------------------------------- main ---------------------------------------
if __name__ == "__main__":
    import numpy as np

    key = jax.random.PRNGKey(0)
    k_params, k_idx = jax.random.split(key)
    params = init_params(k_params)
    fused = fuse_params(params)            # weight fusion done once, not per call

    batch, seq_len = 2, 15
    idx = jax.random.randint(k_idx, (batch, seq_len), 0, CLASSES)
    x = jax.nn.one_hot(idx, CLASSES, axis=1, dtype=jnp.float32)  # (N, CLASSES, L)

    out = wavenet_decoder_forward(x, fused)
    out = jax.block_until_ready(out)

    ref = wavenet_decoder_reference(x, params)
    assert out.shape == (batch, CLASSES, seq_len)
    np.testing.assert_allclose(np.asarray(out), np.asarray(ref), rtol=2e-3, atol=2e-3)

    print("KERNEL_OK")
</pallas_src>

<mosaic_0001>
module attributes {stable_mosaic.version = 11 : i64} {
  func.func @_wavenet_kernel(%arg0: i32, %arg1: memref<1x15x16xf32, #tpu.memory_space<vmem>>, %arg2: memref<3x16x32xf32, #tpu.memory_space<vmem>>, %arg3: memref<3x16x32xf32, #tpu.memory_space<vmem>>, %arg4: memref<3x16x32xf32, #tpu.memory_space<vmem>>, %arg5: memref<16x16xf32, #tpu.memory_space<vmem>>, %arg6: memref<1x16xf32, #tpu.memory_space<vmem>>, %arg7: memref<16x16xf32, #tpu.memory_space<vmem>>, %arg8: memref<1x16xf32, #tpu.memory_space<vmem>>, %arg9: memref<1x15x16xf32, #tpu.memory_space<vmem>>) attributes {dimension_semantics = [#tpu.dimension_semantics<parallel>], iteration_bounds = array<i64: 2>, scalar_prefetch = 0 : i64, scratch_operands = 0 : i64, tpu.core_type = #tpu.core_type<tc>, window_params = [{transform_indices = @transform_0, window_bounds = array<i64: 1, 15, 16>}, {pipeline_mode = #tpu.pipeline_mode<synchronous>, transform_indices = @transform_1, window_bounds = array<i64: 3, 16, 32>}, {pipeline_mode = #tpu.pipeline_mode<synchronous>, transform_indices = @transform_2, window_bounds = array<i64: 3, 16, 32>}, {pipeline_mode = #tpu.pipeline_mode<synchronous>, transform_indices = @transform_3, window_bounds = array<i64: 3, 16, 32>}, {pipeline_mode = #tpu.pipeline_mode<synchronous>, transform_indices = @transform_4, window_bounds = array<i64: 16, 16>}, {pipeline_mode = #tpu.pipeline_mode<synchronous>, transform_indices = @transform_5, window_bounds = array<i64: 1, 16>}, {pipeline_mode = #tpu.pipeline_mode<synchronous>, transform_indices = @transform_6, window_bounds = array<i64: 16, 16>}, {pipeline_mode = #tpu.pipeline_mode<synchronous>, transform_indices = @transform_7, window_bounds = array<i64: 1, 16>}, {transform_indices = @transform_8, window_bounds = array<i64: 1, 15, 16>}]} {
    %cst = arith.constant 0.000000e+00 : f32
    %0 = vector.broadcast %cst : f32 to vector<1x9x16xf32>
    %c0 = arith.constant 0 : index
    %c0_0 = arith.constant 0 : index
    %c0_1 = arith.constant 0 : index
    %1 = vector.load %arg1[%c0, %c0_0, %c0_1] : memref<1x15x16xf32, #tpu.memory_space<vmem>>, vector<1x15x16xf32>
    %2 = tpu.concatenate %1, %0 in 1 : vector<1x15x16xf32>, vector<1x9x16xf32> -> vector<1x24x16xf32>
    %3 = vector.shape_cast %2 : vector<1x24x16xf32> to vector<24x16xf32>
    %4 = vector.extract_strided_slice %3 {offsets = [1, 0], sizes = [23, 16], strides = [1, 1]} : vector<24x16xf32> to vector<23x16xf32>
    %cst_2 = arith.constant 0.000000e+00 : f32
    %5 = vector.broadcast %cst_2 : f32 to vector<1x16xf32>
    %6 = tpu.concatenate %4, %5 in 0 : vector<23x16xf32>, vector<1x16xf32> -> vector<24x16xf32>
    %c0_3 = arith.constant 0 : index
    %c0_4 = arith.constant 0 : index
    %c0_5 = arith.constant 0 : index
    %7 = vector.load %arg2[%c0_3, %c0_4, %c0_5] : memref<3x16x32xf32, #tpu.memory_space<vmem>>, vector<1x16x32xf32>
    %8 = vector.shape_cast %7 : vector<1x16x32xf32> to vector<16x32xf32>
    %cst_6 = arith.constant dense<0.000000e+00> : vector<24x32xf32>
    %9 = tpu.matmul %3, %8, %cst_6 {dimension_numbers = #tpu.dot_dimension_numbers<[1], [0], [0], [1], [0, 0, 1, 1], [], []>} : vector<24x16xf32>, vector<16x32xf32>, vector<24x32xf32> -> vector<24x32xf32>
    %c0_7 = arith.constant 0 : index
    %c0_8 = arith.constant 0 : index
    %c0_9 = arith.constant 0 : index
    %10 = vector.load %arg3[%c0_7, %c0_8, %c0_9] : memref<3x16x32xf32, #tpu.memory_space<vmem>>, vector<1x16x32xf32>
    %11 = vector.shape_cast %10 : vector<1x16x32xf32> to vector<16x32xf32>
    %cst_10 = arith.constant dense<0.000000e+00> : vector<24x32xf32>
    %12 = tpu.matmul %6, %11, %cst_10 {dimension_numbers = #tpu.dot_dimension_numbers<[1], [0], [0], [1], [0, 0, 1, 1], [], []>} : vector<24x16xf32>, vector<16x32xf32>, vector<24x32xf32> -> vector<24x32xf32>
    %13 = arith.addf %9, %12 : vector<24x32xf32>
    %14 = vector.extract_strided_slice %13 {offsets = [0, 0], sizes = [24, 16], strides = [1, 1]} : vector<24x32xf32> to vector<24x16xf32>
    %15 = math.tanh %14 : vector<24x16xf32>
    %16 = vector.extract_strided_slice %13 {offsets = [0, 16], sizes = [24, 16], strides = [1, 1]} : vector<24x32xf32> to vector<24x16xf32>
    %17 = arith.negf %16 : vector<24x16xf32>
    %18 = math.exp %17 : vector<24x16xf32>
    %cst_11 = arith.constant 1.000000e+00 : f32
    %19 = vector.broadcast %cst_11 : f32 to vector<24x16xf32>
    %20 = arith.addf %19, %18 : vector<24x16xf32>
    %21 = arith.divf %19, %20 : vector<24x16xf32>
    %22 = arith.mulf %15, %21 : vector<24x16xf32>
    %c0_12 = arith.constant 0 : index
    %c0_13 = arith.constant 0 : index
    %c0_14 = arith.constant 0 : index
    %23 = vector.load %arg4[%c0_12, %c0_13, %c0_14] : memref<3x16x32xf32, #tpu.memory_space<vmem>>, vector<1x16x32xf32>
    %24 = vector.shape_cast %23 : vector<1x16x32xf32> to vector<16x32xf32>
    %cst_15 = arith.constant dense<0.000000e+00> : vector<24x32xf32>
    %25 = tpu.matmul %22, %24, %cst_15 {dimension_numbers = #tpu.dot_dimension_numbers<[1], [0], [0], [1], [0, 0, 1, 1], [], []>} : vector<24x16xf32>, vector<16x32xf32>, vector<24x32xf32> -> vector<24x32xf32>
    %26 = vector.extract_strided_slice %25 {offsets = [0, 0], sizes = [24, 16], strides = [1, 1]} : vector<24x32xf32> to vector<24x16xf32>
    %27 = vector.extract_strided_slice %25 {offsets = [0, 16], sizes = [24, 16], strides = [1, 1]} : vector<24x32xf32> to vector<24x16xf32>
    %28 = arith.addf %27, %3 : vector<24x16xf32>
    %29 = vector.extract_strided_slice %28 {offsets = [2, 0], sizes = [22, 16], strides = [1, 1]} : vector<24x16xf32> to vector<22x16xf32>
    %cst_16 = arith.constant 0.000000e+00 : f32
    %30 = vector.broadcast %cst_16 : f32 to vector<2x16xf32>
    %31 = tpu.concatenate %29, %30 in 0 : vector<22x16xf32>, vector<2x16xf32> -> vector<24x16xf32>
    %c1 = arith.constant 1 : index
    %c0_17 = arith.constant 0 : index
    %c0_18 = arith.constant 0 : index
    %32 = vector.load %arg2[%c1, %c0_17, %c0_18] : memref<3x16x32xf32, #tpu.memory_space<vmem>>, vector<1x16x32xf32>
    %33 = vector.shape_cast %32 : vector<1x16x32xf32> to vector<16x32xf32>
    %cst_19 = arith.constant dense<0.000000e+00> : vector<24x32xf32>
    %34 = tpu.matmul %28, %33, %cst_19 {dimension_numbers = #tpu.dot_dimension_numbers<[1], [0], [0], [1], [0, 0, 1, 1], [], []>} : vector<24x16xf32>, vector<16x32xf32>, vector<24x32xf32> -> vector<24x32xf32>
    %c1_20 = arith.constant 1 : index
    %c0_21 = arith.constant 0 : index
    %c0_22 = arith.constant 0 : index
    %35 = vector.load %arg3[%c1_20, %c0_21, %c0_22] : memref<3x16x32xf32, #tpu.memory_space<vmem>>, vector<1x16x32xf32>
    %36 = vector.shape_cast %35 : vector<1x16x32xf32> to vector<16x32xf32>
    %cst_23 = arith.constant dense<0.000000e+00> : vector<24x32xf32>
    %37 = tpu.matmul %31, %36, %cst_23 {dimension_numbers = #tpu.dot_dimension_numbers<[1], [0], [0], [1], [0, 0, 1, 1], [], []>} : vector<24x16xf32>, vector<16x32xf32>, vector<24x32xf32> -> vector<24x32xf32>
    %38 = arith.addf %34, %37 : vector<24x32xf32>
    %39 = vector.extract_strided_slice %38 {offsets = [0, 0], sizes = [24, 16], strides = [1, 1]} : vector<24x32xf32> to vector<24x16xf32>
    %40 = math.tanh %39 : vector<24x16xf32>
    %41 = vector.extract_strided_slice %38 {offsets = [0, 16], sizes = [24, 16], strides = [1, 1]} : vector<24x32xf32> to vector<24x16xf32>
    %42 = arith.negf %41 : vector<24x16xf32>
    %43 = math.exp %42 : vector<24x16xf32>
    %cst_24 = arith.constant 1.000000e+00 : f32
    %44 = vector.broadcast %cst_24 : f32 to vector<24x16xf32>
    %45 = arith.addf %44, %43 : vector<24x16xf32>
    %46 = arith.divf %44, %45 : vector<24x16xf32>
    %47 = arith.mulf %40, %46 : vector<24x16xf32>
    %c1_25 = arith.constant 1 : index
    %c0_26 = arith.constant 0 : index
    %c0_27 = arith.constant 0 : index
    %48 = vector.load %arg4[%c1_25, %c0_26, %c0_27] : memref<3x16x32xf32, #tpu.memory_space<vmem>>, vector<1x16x32xf32>
    %49 = vector.shape_cast %48 : vector<1x16x32xf32> to vector<16x32xf32>
    %cst_28 = arith.constant dense<0.000000e+00> : vector<24x32xf32>
    %50 = tpu.matmul %47, %49, %cst_28 {dimension_numbers = #tpu.dot_dimension_numbers<[1], [0], [0], [1], [0, 0, 1, 1], [], []>} : vector<24x16xf32>, vector<16x32xf32>, vector<24x32xf32> -> vector<24x32xf32>
    %51 = vector.extract_strided_slice %50 {offsets = [0, 0], sizes = [24, 16], strides = [1, 1]} : vector<24x32xf32> to vector<24x16xf32>
    %52 = arith.addf %26, %51 : vector<24x16xf32>
    %53 = vector.extract_strided_slice %50 {offsets = [0, 16], sizes = [24, 16], strides = [1, 1]} : vector<24x32xf32> to vector<24x16xf32>
    %54 = arith.addf %53, %28 : vector<24x16xf32>
    %55 = vector.extract_strided_slice %54 {offsets = [4, 0], sizes = [20, 16], strides = [1, 1]} : vector<24x16xf32> to vector<20x16xf32>
    %cst_29 = arith.constant 0.000000e+00 : f32
    %56 = vector.broadcast %cst_29 : f32 to vector<4x16xf32>
    %57 = tpu.concatenate %55, %56 in 0 : vector<20x16xf32>, vector<4x16xf32> -> vector<24x16xf32>
    %c2 = arith.constant 2 : index
    %c0_30 = arith.constant 0 : index
    %c0_31 = arith.constant 0 : index
    %58 = vector.load %arg2[%c2, %c0_30, %c0_31] : memref<3x16x32xf32, #tpu.memory_space<vmem>>, vector<1x16x32xf32>
    %59 = vector.shape_cast %58 : vector<1x16x32xf32> to vector<16x32xf32>
    %cst_32 = arith.constant dense<0.000000e+00> : vector<24x32xf32>
    %60 = tpu.matmul %54, %59, %cst_32 {dimension_numbers = #tpu.dot_dimension_numbers<[1], [0], [0], [1], [0, 0, 1, 1], [], []>} : vector<24x16xf32>, vector<16x32xf32>, vector<24x32xf32> -> vector<24x32xf32>
    %c2_33 = arith.constant 2 : index
    %c0_34 = arith.constant 0 : index
    %c0_35 = arith.constant 0 : index
    %61 = vector.load %arg3[%c2_33, %c0_34, %c0_35] : memref<3x16x32xf32, #tpu.memory_space<vmem>>, vector<1x16x32xf32>
    %62 = vector.shape_cast %61 : vector<1x16x32xf32> to vector<16x32xf32>
    %cst_36 = arith.constant dense<0.000000e+00> : vector<24x32xf32>
    %63 = tpu.matmul %57, %62, %cst_36 {dimension_numbers = #tpu.dot_dimension_numbers<[1], [0], [0], [1], [0, 0, 1, 1], [], []>} : vector<24x16xf32>, vector<16x32xf32>, vector<24x32xf32> -> vector<24x32xf32>
    %64 = arith.addf %60, %63 : vector<24x32xf32>
    %65 = vector.extract_strided_slice %64 {offsets = [0, 0], sizes = [24, 16], strides = [1, 1]} : vector<24x32xf32> to vector<24x16xf32>
    %66 = math.tanh %65 : vector<24x16xf32>
    %67 = vector.extract_strided_slice %64 {offsets = [0, 16], sizes = [24, 16], strides = [1, 1]} : vector<24x32xf32> to vector<24x16xf32>
    %68 = arith.negf %67 : vector<24x16xf32>
    %69 = math.exp %68 : vector<24x16xf32>
    %cst_37 = arith.constant 1.000000e+00 : f32
    %70 = vector.broadcast %cst_37 : f32 to vector<24x16xf32>
    %71 = arith.addf %70, %69 : vector<24x16xf32>
    %72 = arith.divf %70, %71 : vector<24x16xf32>
    %73 = arith.mulf %66, %72 : vector<24x16xf32>
    %c2_38 = arith.constant 2 : index
    %c0_39 = arith.constant 0 : index
    %c0_40 = arith.constant 0 : index
    %74 = vector.load %arg4[%c2_38, %c0_39, %c0_40] : memref<3x16x32xf32, #tpu.memory_space<vmem>>, vector<1x16x32xf32>
    %75 = vector.shape_cast %74 : vector<1x16x32xf32> to vector<16x32xf32>
    %cst_41 = arith.constant dense<0.000000e+00> : vector<24x32xf32>
    %76 = tpu.matmul %73, %75, %cst_41 {dimension_numbers = #tpu.dot_dimension_numbers<[1], [0], [0], [1], [0, 0, 1, 1], [], []>} : vector<24x16xf32>, vector<16x32xf32>, vector<24x32xf32> -> vector<24x32xf32>
    %77 = vector.extract_strided_slice %76 {offsets = [0, 0], sizes = [24, 16], strides = [1, 1]} : vector<24x32xf32> to vector<24x16xf32>
    %78 = arith.addf %52, %77 : vector<24x16xf32>
    %cst_42 = arith.constant 0.000000e+00 : f32
    %79 = vector.broadcast %cst_42 : f32 to vector<24x16xf32>
    %80 = arith.maximumf %78, %79 : vector<24x16xf32>
    %c0_43 = arith.constant 0 : index
    %c0_44 = arith.constant 0 : index
    %81 = vector.load %arg5[%c0_43, %c0_44] : memref<16x16xf32, #tpu.memory_space<vmem>>, vector<16x16xf32>
    %cst_45 = arith.constant dense<0.000000e+00> : vector<24x16xf32>
    %82 = tpu.matmul %80, %81, %cst_45 {dimension_numbers = #tpu.dot_dimension_numbers<[1], [0], [0], [1], [0, 0, 1, 1], [], []>} : vector<24x16xf32>, vector<16x16xf32>, vector<24x16xf32> -> vector<24x16xf32>
    %c0_46 = arith.constant 0 : index
    %c0_47 = arith.constant 0 : index
    %83 = vector.load %arg6[%c0_46, %c0_47] : memref<1x16xf32, #tpu.memory_space<vmem>>, vector<1x16xf32>
    %84 = vector.broadcast %83 : vector<1x16xf32> to vector<24x16xf32>
    %85 = arith.addf %82, %84 : vector<24x16xf32>
    %cst_48 = arith.constant 0.000000e+00 : f32
    %86 = vector.broadcast %cst_48 : f32 to vector<24x16xf32>
    %87 = arith.maximumf %85, %86 : vector<24x16xf32>
    %c0_49 = arith.constant 0 : index
    %c0_50 = arith.constant 0 : index
    %88 = vector.load %arg7[%c0_49, %c0_50] : memref<16x16xf32, #tpu.memory_space<vmem>>, vector<16x16xf32>
    %cst_51 = arith.constant dense<0.000000e+00> : vector<24x16xf32>
    %89 = tpu.matmul %87, %88, %cst_51 {dimension_numbers = #tpu.dot_dimension_numbers<[1], [0], [0], [1], [0, 0, 1, 1], [], []>} : vector<24x16xf32>, vector<16x16xf32>, vector<24x16xf32> -> vector<24x16xf32>
    %c0_52 = arith.constant 0 : index
    %c0_53 = arith.constant 0 : index
    %90 = vector.load %arg8[%c0_52, %c0_53] : memref<1x16xf32, #tpu.memory_space<vmem>>, vector<1x16xf32>
    %91 = vector.broadcast %90 : vector<1x16xf32> to vector<24x16xf32>
    %92 = arith.addf %89, %91 : vector<24x16xf32>
    %93 = vector.shape_cast %92 : vector<24x16xf32> to vector<1x24x16xf32>
    %94 = vector.extract_strided_slice %93 {offsets = [0, 0, 0], sizes = [1, 15, 16], strides = [1, 1, 1]} : vector<1x24x16xf32> to vector<1x15x16xf32>
    %c0_54 = arith.constant 0 : index
    %c0_55 = arith.constant 0 : index
    %c0_56 = arith.constant 0 : index
    %95 = vector.load %arg9[%c0_54, %c0_55, %c0_56] : memref<1x15x16xf32, #tpu.memory_space<vmem>>, vector<1x15x16xf32>
    tpu.vector_store %arg9[%c0_54, %c0_55, %c0_56], %94 {strides = array<i32>} : memref<1x15x16xf32, #tpu.memory_space<vmem>>, vector<1x15x16xf32>,
    return
  }
  func.func @transform_0(%arg0: i32) -> (i32, i32, i32) {
    %c0_i32 = arith.constant 0 : i32
    %c0_i32_0 = arith.constant 0 : i32
    %c0_i32_1 = arith.constant 0 : i32
    return %arg0, %c0_i32, %c0_i32_0 : i32, i32, i32
  }
  func.func @transform_1(%arg0: i32) -> (i32, i32, i32) {
    %c0_i32 = arith.constant 0 : i32
    %c0_i32_0 = arith.constant 0 : i32
    %c0_i32_1 = arith.constant 0 : i32
    %c0_i32_2 = arith.constant 0 : i32
    return %c0_i32, %c0_i32_0, %c0_i32_1 : i32, i32, i32
  }
  func.func @transform_2(%arg0: i32) -> (i32, i32, i32) {
    %c0_i32 = arith.constant 0 : i32
    %c0_i32_0 = arith.constant 0 : i32
    %c0_i32_1 = arith.constant 0 : i32
    %c0_i32_2 = arith.constant 0 : i32
    return %c0_i32, %c0_i32_0, %c0_i32_1 : i32, i32, i32
  }
  func.func @transform_3(%arg0: i32) -> (i32, i32, i32) {
    %c0_i32 = arith.constant 0 : i32
    %c0_i32_0 = arith.constant 0 : i32
    %c0_i32_1 = arith.constant 0 : i32
    %c0_i32_2 = arith.constant 0 : i32
    return %c0_i32, %c0_i32_0, %c0_i32_1 : i32, i32, i32
  }
  func.func @transform_4(%arg0: i32) -> (i32, i32) {
    %c0_i32 = arith.constant 0 : i32
    %c0_i32_0 = arith.constant 0 : i32
    %c0_i32_1 = arith.constant 0 : i32
    return %c0_i32, %c0_i32_0 : i32, i32
  }
  func.func @transform_5(%arg0: i32) -> (i32, i32) {
    %c0_i32 = arith.constant 0 : i32
    %c0_i32_0 = arith.constant 0 : i32
    %c0_i32_1 = arith.constant 0 : i32
    return %c0_i32, %c0_i32_0 : i32, i32
  }
  func.func @transform_6(%arg0: i32) -> (i32, i32) {
    %c0_i32 = arith.constant 0 : i32
    %c0_i32_0 = arith.constant 0 : i32
    %c0_i32_1 = arith.constant 0 : i32
    return %c0_i32, %c0_i32_0 : i32, i32
  }
  func.func @transform_7(%arg0: i32) -> (i32, i32) {
    %c0_i32 = arith.constant 0 : i32
    %c0_i32_0 = arith.constant 0 : i32
    %c0_i32_1 = arith.constant 0 : i32
    return %c0_i32, %c0_i32_0 : i32, i32
  }
  func.func @transform_8(%arg0: i32) -> (i32, i32, i32) {
    %c0_i32 = arith.constant 0 : i32
    %c0_i32_0 = arith.constant 0 : i32
    %c0_i32_1 = arith.constant 0 : i32
    return %arg0, %c0_i32, %c0_i32_0 : i32, i32, i32
  }
}

</mosaic_0001>

<bundles_post_ra>
// kernel: tpu_custom_call.1
= control target key start
LH: loop header
LB: loop body
LE: loop exit
PB: predicated region body
PF: predicated region fallthrough
CT: control target
= control target key end

     0   :  { %13 = vsyncpa [#allocation3], 0  ;;  %s2469_s0 = inlined_call_operand.vmem [shape: f32[2,15,16], index: 0, kind: input, shape index: {}]   ;;  %s2470_s1 = inlined_call_operand.vmem [shape: f32[3,16,32], index: 1, kind: input, shape index: {}]   ;;  %s2471_s2 = inlined_call_operand.hbm [shape: f32[3,16,32], index: 2, kind: input, shape index: {}]   ;;  %s2472_s3 = inlined_call_operand.hbm [shape: f32[3,16,32], index: 3, kind: input, shape index: {}]   ;;  %s2473_s4 = inlined_call_operand.vmem [shape: f32[16,16], index: 4, kind: input, shape index: {}]   ;;  %s2474_s5 = inlined_call_operand.vmem [shape: f32[1,16], index: 5, kind: input, shape index: {}]   ;;  %s2475_s6 = inlined_call_operand.hbm [shape: f32[16,16], index: 6, kind: input, shape index: {}]   ;;  %s2476_s7 = inlined_call_operand.vmem [shape: f32[1,16], index: 7, kind: input, shape index: {}]   ;;  %s2477_s8 = inlined_call_operand.vmem [shape: f32[2,15,16], index: 8, kind: output, shape index: {}]  }
   0x1   :  { %14 = vsyncpa [#allocation5], 0  ;;  %s2155_s27 = smov 0  }
   0x2 LB: > { %s2161_s28 = sadd.s32 4294967295, %s2099_s27   ;;  %p1642_p0 = scmp.ge.s32.totalorder %s2099_s27, 1  ;;  %s2099_s27 = sphi %s2155_s27, %s20_s27  }
   0x3   : > { %p224_p1 = scmp.lt.s32.totalorder %s2099_s27, 3  ;;  %p1930_p2 = scmp.eq.s32.totalorder %s2161_s28, 0 }
   0x4   : > { %s2101_s30 = smov [#allocation4]   ;;  %s2102_s10 = smov [#allocation2]  }
   0x5   : > { %p2166_p3 = pnand %p1642_p0, %p224_p1  ;;  %s252_s9 = sshll.u32 %s2101_s30, 4  ;;  %s253_s9 = int_to_ptr.vmem [resolvable:$true] %s252_s9 }
   0x6   : > { %s239_s11 = sshll.u32 %s2102_s10, 4  ;;  %s2103_s13 = smov [#allocation6]   ;;  %s240_s11 = int_to_ptr.vmem [resolvable:$true] %s239_s11 }
   0x7   : > { %p1920_p4 = pneg %p2166_p3  ;;  %s271_s14 = sshll.u32 %s2103_s13, 4  ;;  %s2178_s14 = int_to_ptr.vmem [resolvable:$true] %s271_s14 }
   0x8   : > { %s2018_s15 = scalar_lea.vmem %s253_s9, 768  ;;  %p2026_p10 = scmp.lt.s32.totalorder %s253_s9, %s253_s9 }
   0x9   : > { %p2174_p5 = pnand %p1930_p2, %p1920_p4  ;;  %p2019_p7 = scmp.ne.s32.totalorder %s253_s9, %s2018_s15 }
   0xa   : > { %p2027_p11 = scmp.lt.s32.totalorder %s2018_s15, %s2018_s15 }
   0xb   : > { %p2009_p6 = pneg %p2174_p5 }
   0xc   : > { %p2028_p12 = por %p2027_p11, %p2026_p10 }
   0xd   : > { %p2021_p8 = pnand %p2019_p7, %p2009_p6 }
   0xf   : > { %p2022_p9 = pneg %p2021_p8 }
  0x11   : > { %p2029_p13 = pnand %p2028_p12, %p2022_p9 }
  0x13   : > { %2032 = shalt.err (!%p2029_p13)
}
  0x14   : > { %s2104_s16 = smov 128   ;;  %s2105_s17 = smov 8  }
  0x15   : > { %1926 = dma.hbm_to_vmem [thread:$0]  (!%p2174_p5), %s2472_s3, 768, %s253_s9, [#allocation5], %s2104_s16, %s2104_s16, %s2105_s17  }
  0x16   : > { %s2044_s20 = scalar_lea.vmem %s240_s11, 768  ;;  %p2052_p7 = scmp.lt.s32.totalorder %s240_s11, %s240_s11 }
  0x17   : > { %p2045_p0 = scmp.ne.s32.totalorder %s240_s11, %s2044_s20  ;;  %p2053_p8 = scmp.lt.s32.totalorder %s2044_s20, %s2044_s20 }
  0x19   : > { %p2047_p1 = pnand %p2045_p0, %p2009_p6  ;;  %p2054_p10 = por %p2053_p8, %p2052_p7 }
  0x1b   : > { %p2048_p4 = pneg %p2047_p1 }
  0x1d   : > { %p2055_p9 = pnand %p2054_p10, %p2048_p4 }
  0x1f   : > { %2058 = shalt.err (!%p2055_p9)
}
  0x20   : > { %1923 = dma.hbm_to_vmem [thread:$0]  (!%p2174_p5), %s2471_s2, 768, %s240_s11, [#allocation3], %s2104_s16, %s2104_s16, %s2105_s17  }
  0x21   : > { %s2070_s23 = scalar_lea.vmem %s2178_s14, 256  ;;  %p2078_p0 = scmp.lt.s32.totalorder %s2178_s14, %s2178_s14 }
  0x22   : > { %p2071_p11 = scmp.ne.s32.totalorder %s2178_s14, %s2070_s23  ;;  %p2079_p1 = scmp.lt.s32.totalorder %s2070_s23, %s2070_s23 }
  0x24   : > { %p2073_p12 = pnand %p2071_p11, %p2009_p6  ;;  %p2080_p4 = por %p2079_p1, %p2078_p0 }
  0x26   : > { %p2074_p13 = pneg %p2073_p12 }
  0x28   : > { %p2081_p7 = pnand %p2080_p4, %p2074_p13 }
  0x2a   : > { %2084 = shalt.err (!%p2081_p7)
}
  0x2b   : > { %1929 = dma.hbm_to_vmem [thread:$0]  (!%p2174_p5), %s2475_s6, 256, %s2178_s14, [#allocation5], %s2104_s16, %s2104_s16, %s2105_s17  }
  0x2c   : > { %298 = sbr.rel (%p2166_p3) target bundleno = 2333 (0x91d), region = 52 }
  0x31   : > { %2090 = dma.done.wait (%p1930_p2), [#allocation3], 768  }
  0x32   : > { %2092 = vsyncadd (%p1930_p2), [#allocation3], 4294966528 }
  0x33   : > { %2094 = dma.done.wait (%p1930_p2), [#allocation5], 1024  }
  0x34   : > { %2096 = vsyncadd (%p1930_p2), [#allocation5], 4294966272  ;;  %p340_p6 = scmp.lt.s32.totalorder %s2161_s28, 1  ;;  %v2106_v0 = vmov 0.0   ;;  %vm2107_vm0 = vmmov 0   ;;  %vm352_vm1 = vcmask 1046528  }
  0x35   : > { %1904 = vmatprep.subr.mxu1 %v2106_v0  ;;  %1768 = vmatprep.mubr.msk.f32.mxu1 %vm2107_vm0, %v2106_v0  ;;  %v367_v1 = vld [vmem:[#allocation2 + $0x8] sm:$0xff]  ;;  %v366_v2 = vld [vmem:[#allocation2] sm:$0xff]  ;;  %v360_v4 = vrot.slane %v2106_v0, 1  ;;  %vm368_vm2 = vcmask 130048   ;;  %v579_v14 = vld [vmem:[#allocation4 + $0x8] sm:$0xff]  ;;  %s2108_s14 = smov 112  }
  0x36   : > { %s2481_s28 = smov (!%p340_p6, %s2161_s28), 1  ;;  %1761 = vmatprep.subr.mxu0 %v2106_v0  ;;  %1765 = vmatprep.mubr.msk.f32.mxu0 %vm2107_vm0, %v2106_v0  ;;  %v365_v9 = vld [vmem:[%s2470_s1 + $0x8] sm:$0xff]  ;;  %v364_v12 = vld [vmem:[%s2470_s1] sm:$0xff]  ;;  %v578_v36 = vld [vmem:[#allocation4] sm:$0xff]  ;;  %s2109_s15 = smov 16   ;;  %vm684_vm3 = vcmask 1045504  }
  0x37   : > { %s1704_s26 = sshll.u32 %s2481_s28, 4  ;;  %1906 = vmatpush3.msra.mxu1 %v367_v1  ;;  %1762 = vmatpush3.msra.mxu0 %v367_v1  ;;  %v363_v13 = vsel %vm352_vm1, %v360_v4, 0.0  ;;  %v697_v52 = vld [vmem:[#allocation2 + $0x18] sm:$0xff]  ;;  %v1666_v54 = vld [vmem:[%s2470_s1 + $0x10] sm:$0xff]  ;;  %vm1020_vm4 = vcmask 1043456   ;;  %vm1552_vm5 = vcmask 129024  }
  0x38   : > { %s344_s9 = scalar_lea.vmem %s2469_s0, %s1704_s26  ;;  %1905 = vmatprep.subr.mxu1 %v2106_v0  ;;  %1763 = vmatprep.subr.mxu0 %v2106_v0  ;;  %v1667_v53 = vld [vmem:[%s2470_s1 + $0x18] sm:$0xff]  ;;  %v696_v55 = vld [vmem:[#allocation2 + $0x10] sm:$0xff] }
  0x39   : > { %v351_v3 = vld [vmem:[%s344_s9 + $0x8] sm:$0x7f]  ;;  %v2241_v6 = vld [vmem:[%s344_s9] sm:$0xff]  ;;  %1907 = vmatpush3.msra.mxu1 %v366_v2  ;;  %1764 = vmatpush3.msra.mxu0 %v366_v2 }
  0x3a   : > { %v2239_v5 = vsel %vm352_vm1, %v351_v3, 0.0  ;;  %v357_v8 = vrot.slane %v2241_v6, 1  ;;  %1774 = vmatprep.subr.mxu1 %v2106_v0  ;;  %1787 = vmatprep.subr.mxu0 %v2106_v0 }
  0x3b   : > { %v358_v7 = vrot.slane %v2239_v5, 1 }
  0x3d   : > { %v361_v10 = vsel %vm352_vm1, %v358_v7, %v360_v4  ;;  %v359_v11 = vsel %vm352_vm1, %v357_v8, %v358_v7 }
  0x3e   : > { %1769 = vmatmul.mubr.msk.f32.vlgmr.msra.gmra.mxu1 %vm368_vm2, %v361_v10  ;;  %1766 = vmatmul.mubr.msk.f32.vlgmr.msra.gmra.mxu0 %vm368_vm2, %v359_v11 }
  0x3f   : > { %1775 = vmatpush3.msra.mxu1 %v365_v9  ;;  %1771 = vmatprep.mubr.msk.f32.mxu1 %vm2107_vm0, %v2106_v0 }
  0x40   : > { %1776 = vmatprep.subr.mxu1 %v2106_v0  ;;  %1791 = vmatprep.mubr.msk.f32.mxu0 %vm2107_vm0, %v2106_v0 }
  0x41   : > { %1777 = vmatpush3.msra.mxu1 %v364_v12  ;;  %1788 = vmatpush3.msra.mxu0 %v579_v14 }
  0x42   : > { %1772 = vmatmul.mubr.msk.f32.gmra.mxu1 %vm368_vm2, %v363_v13  ;;  %1800 = vmatprep.subr.mxu1 %v2106_v0 }
  0x43   : > { %1778 = vmatprep.mubr.msk.f32.mxu1 %vm2107_vm0, %v2106_v0  ;;  %1789 = vmatprep.subr.mxu0 %v2106_v0 }
  0x44   : > { %1790 = vmatpush3.msra.mxu0 %v578_v36 }
  0x45   : > { %1813 = vmatprep.subr.mxu0 %v2106_v0 }
  0x46   : > { %1779 = vmatmul.mubr.msk.f32.vlgmr.msra.gmra.mxu1 %vm368_vm2, %v2241_v6 }
  0x47   : > { %1781 = vmatprep.mubr.msk.f32.mxu1 %vm2107_vm0, %v2106_v0  ;;  %1801 = vmatpush3.msra.mxu1 %v697_v52 }
  0x48   : > { %1802 = vmatprep.subr.mxu1 %v2106_v0 }
  0x49   : > { %1803 = vmatpush3.msra.mxu1 %v696_v55  ;;  %v1033_v55 = vld [vmem:[#allocation2 + $0x28] sm:$0xff] }
  0x4a   : > { %1782 = vmatmul.mubr.msk.f32.gmra.mxu1 %vm368_vm2, %v2239_v5  ;;  %1826 = vmatprep.subr.mxu1 %v2106_v0 }
  0x4b   : > { %1784 = vmatprep.mubr.msk.f32.mxu1 %vm2107_vm0, %v2106_v0 }
  0x4e   : > { %1785 = vmatmul.mubr.f32.gmra.mxu1 %v2106_v0 }
  0x4f   : > { %1804 = vmatprep.mubr.msk.f32.mxu1 %vm2107_vm0, %v2106_v0 }
  0xfe   : > { %v447_v15 = vpop.f32.mrf.mxu1  ;;  %v442_v16 = vpop.f32.mrf.mxu0 }
 0x100   : > { %v1770_v17 = vpop.f32.mrf.mxu1  ;;  %v1767_v18 = vpop.f32.mrf.mxu0 }
 0x101   : > { %v921_v17 = vld [vmem:[#allocation4 + $0x18] sm:$0xff]  ;;  %v920_v18 = vld [vmem:[#allocation4 + $0x10] sm:$0xff] }
 0x102   : > { %v452_v19 = vpop.f32.mrf.mxu1 }
 0x104   : > { %v1773_v20 = vpop.f32.mrf.mxu1 }
 0x106   : > { %v528_v21 = vpop.f32.mrf.mxu1 }
 0x107   : > { %v529_v22 = vadd.f32 %v528_v21, %v442_v16 }
 0x108   : > { %v1780_v23 = vpop.f32.mrf.mxu1 }
 0x109   : > { %v1660_v24 = vmul.f32 -1.442695, %v529_v22 }
 0x10a   : > { %v533_v25 = vpop.f32.mrf.mxu1 }
 0x10b   : > { %1953 = vpow2.f32 %v1660_v24  ;;  %v534_v26 = vadd.f32 %v533_v25, %v447_v15 }
 0x10c   : > { %v1783_v27 = vpop.f32.mrf.mxu1 }
 0x10d   : > { %v1661_v28 = vmul.f32 -1.442695, %v534_v26 }
 0x10e   : > { %v538_v29 = vpop.f32.mrf.mxu1 }
 0x10f   : > { %1955 = vpow2.f32 %v1661_v28  ;;  %v539_v30 = vadd.f32 %v538_v29, %v452_v19 }
 0x110   : > { %v1786_v31 = vpop.f32.mrf.mxu1 }
 0x111   : > { %v1662_v32 = vmul.f32 -1.442695, %v539_v30 }
 0x113   : > { %1957 = vpow2.f32 %v1662_v32 }
 0x118   : > { %v1954_v33 = vpop.eup %1953 }
 0x119   : > { %v554_v34 = vadd.f32 1.0, %v1954_v33 }
 0x11b   : > { %1959 = vrcp.f32 %v554_v34 }
 0x11c   : > { %v1956_v35 = vpop.eup %1955 }
 0x11d   : > { %v555_v37 = vadd.f32 1.0, %v1956_v35 }
 0x11f   : > { %1961 = vrcp.f32 %v555_v37 }
 0x120   : > { %v1958_v38 = vpop.eup %1957 }
 0x121   : > { %v556_v39 = vadd.f32 1.0, %v1958_v38 }
 0x123   : > { %1963 = vrcp.f32 %v556_v39 }
 0x124   : > { %1965 = vtanh.f32 %v529_v22 }
 0x125   : > { %1967 = vtanh.f32 %v534_v26 }
 0x126   : > { %1969 = vtanh.f32 %v539_v30 }
 0x128   : > { %v1960_v40 = vpop.eup %1959 }
 0x129   : > { %566 = vrot.lane.b32.xlu0 %v1960_v40, %s2108_s14 }
 0x12c   : > { %v1962_v41 = vpop.eup %1961 }
 0x12d   : > { %568 = vrot.lane.b32.xlu0 %v1962_v41, %s2108_s14 }
 0x130   : > { %v1964_v42 = vpop.eup %1963 }
 0x131   : > { %570 = vrot.lane.b32.xlu1 %v1964_v42, %s2108_s14  ;;  %671 = vrot.lane.b32.xlu0 %v2239_v5, %s2109_s15  ;;  %v1966_v43 = vpop.eup %1965 }
 0x132   : > { %v1968_v46 = vpop.eup %1967 }
 0x133   : > { %v1970_v49 = vpop.eup %1969 }
 0x135   : > { %669 = vrot.lane.b32.xlu1 %v2241_v6, %s2109_s15 }
 0x139   : > { %673 = vrot.lane.b32.xlu1 %v2106_v0, %s2109_s15  ;;  %s349_s15 = scalar_lea.vmem %s2477_s8, %s1704_s26 }
 0x19b   : > { %v567_v44 = vpop.permute.xlu0 %566 }
 0x19c   : > { %v575_v45 = vmul.f32 %v1966_v43, %v567_v44 }
 0x19e   : > { %1792 = vmatmul.mubr.msk.f32.vlgmr.msra.gmra.mxu0 %vm368_vm2, %v575_v45 }
 0x19f   : > { %v569_v47 = vpop.permute.xlu0 %568  ;;  %1794 = vmatprep.mubr.msk.f32.mxu0 %vm2107_vm0, %v2106_v0  ;;  %1814 = vmatpush3.msra.mxu0 %v1667_v53 }
 0x1a0   : > { %v576_v48 = vmul.f32 %v1968_v46, %v569_v47  ;;  %1815 = vmatprep.subr.mxu0 %v2106_v0 }
 0x1a1   : > { %1816 = vmatpush3.msra.mxu0 %v1666_v54 }
 0x1a2   : > { %1795 = vmatmul.mubr.msk.f32.gmra.mxu0 %vm368_vm2, %v576_v48  ;;  %1839 = vmatprep.subr.mxu0 %v2106_v0 }
 0x1a3   : > { %v571_v50 = vpop.permute.xlu1 %570  ;;  %1797 = vmatprep.mubr.msk.f32.mxu0 %vm2107_vm0, %v2106_v0  ;;  %v672_v60 = vpop.permute.xlu0 %671 }
 0x1a4   : > { %v577_v51 = vmul.f32 %v1970_v49, %v571_v50 }
 0x1a6   : > { %1798 = vmatmul.mubr.msk.f32.gmra.mxu0 %vm368_vm2, %v577_v51 }
 0x1a7   : > { %1817 = vmatprep.mubr.msk.f32.mxu0 %vm2107_vm0, %v2106_v0  ;;  %v670_v56 = vpop.permute.xlu1 %669 }
 0x1ab   : > { %v674_v1 = vpop.permute.xlu1 %673 }
 0x25e   : > { %v2307_v57 = vpop.f32.mrf.mxu0 }
 0x25f   : > { %v2310_v58 = vadd.f32 %v670_v56, %v2307_v57  ;;  %v1681_v56 = vld [vmem:[%s2470_s1 + $0x28] sm:$0xff] }
 0x260   : > { %v1793_v59 = vpop.f32.mrf.mxu0 }
 0x261   : > { %791 = vrot.lane.b32.xlu1 %v2310_v58, %s2108_s14  ;;  %v685_v2 = vrot.slane %v2310_v58, 2  ;;  %v1680_v59 = vld [vmem:[%s2470_s1 + $0x20] sm:$0xff] }
 0x262   : > { %v2314_v61 = vpop.f32.mrf.mxu0 }
 0x263   : > { %v2317_v62 = vadd.f32 %v672_v60, %v2314_v61  ;;  %v1032_v60 = vld [vmem:[#allocation2 + $0x20] sm:$0xff] }
 0x264   : > { %v1796_v63 = vpop.f32.mrf.mxu0 }
 0x265   : > { %793 = vrot.lane.b32.xlu1 %v2317_v62, %s2108_s14  ;;  %v686_v3 = vrot.slane %v2317_v62, 2 }
 0x266   : > { %v2323_v4 = vpop.f32.mrf.mxu0 }
 0x267   : > { %v2326_v5 = vadd.f32 %v674_v1, %v2323_v4  ;;  %v687_v6 = vsel %vm684_vm3, %v685_v2, %v686_v3 }
 0x268   : > { %699 = vrot.lane.b32.xlu0 %v687_v6, %s2108_s14  ;;  %v1799_v7 = vpop.f32.mrf.mxu0 }
 0x269   : > { %795 = vrot.lane.b32.xlu1 %v2326_v5, %s2108_s14  ;;  %v688_v8 = vrot.slane %v2326_v5, 2 }
 0x26b   : > { %v689_v9 = vsel %vm684_vm3, %v686_v3, %v688_v8  ;;  %v691_v10 = vsel %vm684_vm3, %v688_v8, 0.0 }
 0x26c   : > { %701 = vrot.lane.b32.xlu0 %v689_v9, %s2108_s14 }
 0x270   : > { %703 = vrot.lane.b32.xlu0 %v691_v10, %s2108_s14 }
 0x2d3   : > { %v792_v11 = vpop.permute.xlu1 %791 }
 0x2d4   : > { %1818 = vmatmul.mubr.msk.f32.vlgmr.msra.gmra.mxu0 %vm368_vm2, %v792_v11 }
 0x2d5   : > { %1820 = vmatprep.mubr.msk.f32.mxu0 %vm2107_vm0, %v2106_v0  ;;  %1840 = vmatpush3.msra.mxu0 %v1033_v55 }
 0x2d6   : > { %1841 = vmatprep.subr.mxu0 %v2106_v0 }
 0x2d7   : > { %v794_v12 = vpop.permute.xlu1 %793  ;;  %1842 = vmatpush3.msra.mxu0 %v1032_v60 }
 0x2d8   : > { %1821 = vmatmul.mubr.msk.f32.gmra.mxu0 %vm368_vm2, %v794_v12  ;;  %1865 = vmatprep.subr.mxu0 %v2106_v0 }
 0x2d9   : > { %1823 = vmatprep.mubr.msk.f32.mxu0 %vm2107_vm0, %v2106_v0 }
 0x2da   : > { %v700_v13 = vpop.permute.xlu0 %699 }
 0x2db   : > { %1805 = vmatmul.mubr.msk.f32.vlgmr.msra.gmra.mxu1 %vm368_vm2, %v700_v13  ;;  %v796_v14 = vpop.permute.xlu1 %795 }
 0x2dc   : > { %1824 = vmatmul.mubr.msk.f32.gmra.mxu0 %vm368_vm2, %v796_v14  ;;  %1807 = vmatprep.mubr.msk.f32.mxu1 %vm2107_vm0, %v2106_v0 }
 0x2dd   : > { %1843 = vmatprep.mubr.msk.f32.mxu0 %vm2107_vm0, %v2106_v0  ;;  %1827 = vmatpush3.msra.mxu1 %v921_v17 }
 0x2de   : > { %v702_v15 = vpop.permute.xlu0 %701  ;;  %1828 = vmatprep.subr.mxu1 %v2106_v0 }
 0x2df   : > { %1808 = vmatmul.mubr.msk.f32.gmra.mxu1 %vm368_vm2, %v702_v15 }
 0x2e0   : > { %1810 = vmatprep.mubr.msk.f32.mxu1 %vm2107_vm0, %v2106_v0  ;;  %1829 = vmatpush3.msra.mxu1 %v920_v18 }
 0x2e1   : > { %1852 = vmatprep.subr.mxu1 %v2106_v0 }
 0x2e2   : > { %v704_v16 = vpop.permute.xlu0 %703 }
 0x2e3   : > { %1811 = vmatmul.mubr.msk.f32.gmra.mxu1 %vm368_vm2, %v704_v16 }
 0x2e4   : > { %1830 = vmatprep.mubr.msk.f32.mxu1 %vm2107_vm0, %v2106_v0 }
 0x394   : > { %v869_v19 = vpop.f32.mrf.mxu0 }
 0x396   : > { %v1819_v20 = vpop.f32.mrf.mxu0 }
 0x397   : > { %v1257_v20 = vld [vmem:[#allocation4 + $0x28] sm:$0xff] }
 0x398   : > { %v874_v21 = vpop.f32.mrf.mxu0 }
 0x39a   : > { %v1822_v22 = vpop.f32.mrf.mxu0 }
 0x39b   : > { %v777_v23 = vpop.f32.mrf.mxu1 }
 0x39c   : > { %v870_v24 = vadd.f32 %v869_v19, %v777_v23  ;;  %v879_v25 = vpop.f32.mrf.mxu0 }
 0x39d   : > { %v1806_v26 = vpop.f32.mrf.mxu1 }
 0x39e   : > { %v1674_v27 = vmul.f32 -1.442695, %v870_v24  ;;  %v1825_v28 = vpop.f32.mrf.mxu0 }
 0x39f   : > { %v782_v29 = vpop.f32.mrf.mxu1 }
 0x3a0   : > { %1971 = vpow2.f32 %v1674_v27  ;;  %v875_v30 = vadd.f32 %v874_v21, %v782_v29  ;;  %v1256_v21 = vld [vmem:[#allocation4 + $0x20] sm:$0xff] }
 0x3a1   : > { %v1809_v31 = vpop.f32.mrf.mxu1 }
 0x3a2   : > { %v1675_v32 = vmul.f32 -1.442695, %v875_v30 }
 0x3a3   : > { %v787_v33 = vpop.f32.mrf.mxu1 }
 0x3a4   : > { %1973 = vpow2.f32 %v1675_v32  ;;  %v880_v34 = vadd.f32 %v879_v25, %v787_v33 }
 0x3a5   : > { %v1812_v35 = vpop.f32.mrf.mxu1 }
 0x3a6   : > { %v1676_v36 = vmul.f32 -1.442695, %v880_v34 }
 0x3a8   : > { %1975 = vpow2.f32 %v1676_v36 }
 0x3ad   : > { %v1972_v37 = vpop.eup %1971 }
 0x3ae   : > { %v895_v38 = vadd.f32 1.0, %v1972_v37 }
 0x3b0   : > { %1977 = vrcp.f32 %v895_v38 }
 0x3b1   : > { %v1974_v39 = vpop.eup %1973 }
 0x3b2   : > { %v896_v40 = vadd.f32 1.0, %v1974_v39 }
 0x3b4   : > { %1979 = vrcp.f32 %v896_v40 }
 0x3b5   : > { %v1976_v41 = vpop.eup %1975 }
 0x3b6   : > { %v897_v42 = vadd.f32 1.0, %v1976_v41 }
 0x3b8   : > { %1981 = vrcp.f32 %v897_v42 }
 0x3b9   : > { %1983 = vtanh.f32 %v870_v24 }
 0x3ba   : > { %1985 = vtanh.f32 %v875_v30 }
 0x3bb   : > { %1987 = vtanh.f32 %v880_v34 }
 0x3bd   : > { %v1978_v43 = vpop.eup %1977 }
 0x3be   : > { %907 = vrot.lane.b32.xlu0 %v1978_v43, %s2108_s14 }
 0x3c1   : > { %v1980_v44 = vpop.eup %1979 }
 0x3c2   : > { %909 = vrot.lane.b32.xlu1 %v1980_v44, %s2108_s14 }
 0x3c5   : > { %v1982_v45 = vpop.eup %1981 }
 0x3c6   : > { %911 = vrot.lane.b32.xlu0 %v1982_v45, %s2108_s14  ;;  %v1984_v46 = vpop.eup %1983 }
 0x3c7   : > { %v1986_v49 = vpop.eup %1985 }
 0x3c8   : > { %v1988_v52 = vpop.eup %1987 }
 0x430   : > { %v908_v47 = vpop.permute.xlu0 %907 }
 0x431   : > { %v916_v48 = vmul.f32 %v1984_v46, %v908_v47  ;;  %v1354_v46 = vld [vmem:[%s2473_s4 + $0x8] sm:$0xff]  ;;  %v1353_v47 = vld [vmem:[%s2473_s4] sm:$0xff] }
 0x433   : > { %1831 = vmatmul.mubr.msk.f32.vlgmr.msra.gmra.mxu1 %vm368_vm2, %v916_v48 }
 0x434   : > { %v910_v50 = vpop.permute.xlu1 %909  ;;  %1833 = vmatprep.mubr.msk.f32.mxu1 %vm2107_vm0, %v2106_v0  ;;  %1853 = vmatpush3.msra.mxu1 %v1681_v56 }
 0x435   : > { %v917_v51 = vmul.f32 %v1986_v49, %v910_v50  ;;  %1854 = vmatprep.subr.mxu1 %v2106_v0 }
 0x436   : > { %1855 = vmatpush3.msra.mxu1 %v1680_v59 }
 0x437   : > { %1834 = vmatmul.mubr.msk.f32.gmra.mxu1 %vm368_vm2, %v917_v51  ;;  %1878 = vmatprep.subr.mxu1 %v2106_v0 }
 0x438   : > { %v912_v53 = vpop.permute.xlu0 %911  ;;  %1836 = vmatprep.mubr.msk.f32.mxu1 %vm2107_vm0, %v2106_v0 }
 0x439   : > { %v918_v54 = vmul.f32 %v1988_v52, %v912_v53 }
 0x43b   : > { %1837 = vmatmul.mubr.msk.f32.gmra.mxu1 %vm368_vm2, %v918_v54 }
 0x43c   : > { %1856 = vmatprep.mubr.msk.f32.mxu1 %vm2107_vm0, %v2106_v0 }
 0x4f3   : > { %v2376_v63 = vpop.f32.mrf.mxu1 }
 0x4f4   : > { %v1014_v1 = vadd.f32 %v2376_v63, %v2310_v58 }
 0x4f5   : > { %v1832_v2 = vpop.f32.mrf.mxu1 }
 0x4f6   : > { %1127 = vrot.lane.b32.xlu0 %v1014_v1, %s2108_s14  ;;  %v1021_v8 = vrot.slane %v1014_v1, 4  ;;  %v1455_v2 = vld [vmem:[#allocation6 + $0x8] sm:$0xff] }
 0x4f7   : > { %v2381_v3 = vpop.f32.mrf.mxu1 }
 0x4f8   : > { %v1015_v6 = vadd.f32 %v2381_v3, %v2317_v62 }
 0x4f9   : > { %v1835_v7 = vpop.f32.mrf.mxu1 }
 0x4fa   : > { %v1022_v9 = vrot.slane %v1015_v6, 4  ;;  %1129 = vrot.lane.b32.xlu0 %v1015_v6, %s2108_s14  ;;  %v1454_v6 = vld [vmem:[#allocation6] sm:$0xff]  ;;  %v1011_v7 = vadd.f32 %v2376_v63, %v2307_v57 }
 0x4fb   : > { %v2386_v10 = vpop.f32.mrf.mxu1 }
 0x4fc   : > { %v1016_v11 = vadd.f32 %v2386_v10, %v2326_v5  ;;  %v1023_v58 = vsel %vm1020_vm4, %v1021_v8, %v1022_v9 }
 0x4fd   : > { %1035 = vrot.lane.b32.xlu1 %v1023_v58, %s2108_s14  ;;  %v1838_v12 = vpop.f32.mrf.mxu1  ;;  %v1012_v58 = vadd.f32 %v2381_v3, %v2314_v61  ;;  %v1694_v3 = vld [vmem:[%s2474_s5] ss:$0 sm:$0xff] }
 0x4fe   : > { %v1024_v13 = vrot.slane %v1016_v11, 4  ;;  %1131 = vrot.lane.b32.xlu0 %v1016_v11, %s2108_s14 }
 0x500   : > { %v1025_v14 = vsel %vm1020_vm4, %v1022_v9, %v1024_v13  ;;  %v1027_v62 = vsel %vm1020_vm4, %v1024_v13, 0.0 }
 0x501   : > { %1037 = vrot.lane.b32.xlu1 %v1025_v14, %s2108_s14 }
 0x505   : > { %1039 = vrot.lane.b32.xlu1 %v1027_v62, %s2108_s14 }
 0x568   : > { %v1128_v15 = vpop.permute.xlu0 %1127 }
 0x569   : > { %1857 = vmatmul.mubr.msk.f32.vlgmr.msra.gmra.mxu1 %vm368_vm2, %v1128_v15  ;;  %v1013_v15 = vadd.f32 %v2386_v10, %v2323_v4 }
 0x56a   : > { %1859 = vmatprep.mubr.msk.f32.mxu1 %vm2107_vm0, %v2106_v0  ;;  %1879 = vmatpush3.msra.mxu1 %v1354_v46 }
 0x56b   : > { %1880 = vmatprep.subr.mxu1 %v2106_v0 }
 0x56c   : > { %v1130_v5 = vpop.permute.xlu0 %1129  ;;  %1881 = vmatpush3.msra.mxu1 %v1353_v47 }
 0x56d   : > { %1860 = vmatmul.mubr.msk.f32.gmra.mxu1 %vm368_vm2, %v1130_v5 }
 0x56e   : > { %1862 = vmatprep.mubr.msk.f32.mxu1 %vm2107_vm0, %v2106_v0 }
 0x56f   : > { %v1036_v16 = vpop.permute.xlu1 %1035 }
 0x570   : > { %1844 = vmatmul.mubr.msk.f32.vlgmr.msra.gmra.mxu0 %vm368_vm2, %v1036_v16  ;;  %v1132_v17 = vpop.permute.xlu0 %1131 }
 0x571   : > { %1863 = vmatmul.mubr.msk.f32.gmra.mxu1 %vm368_vm2, %v1132_v17  ;;  %1846 = vmatprep.mubr.msk.f32.mxu0 %vm2107_vm0, %v2106_v0 }
 0x572   : > { %1882 = vmatprep.mubr.msk.f32.mxu1 %vm2107_vm0, %v2106_v0  ;;  %1866 = vmatpush3.msra.mxu0 %v1257_v20 }
 0x573   : > { %v1038_v18 = vpop.permute.xlu1 %1037  ;;  %1867 = vmatprep.subr.mxu0 %v2106_v0 }
 0x574   : > { %1847 = vmatmul.mubr.msk.f32.gmra.mxu0 %vm368_vm2, %v1038_v18 }
 0x575   : > { %1849 = vmatprep.mubr.msk.f32.mxu0 %vm2107_vm0, %v2106_v0  ;;  %1868 = vmatpush3.msra.mxu0 %v1256_v21 }
 0x576   : > { %1891 = vmatprep.subr.mxu0 %v2106_v0 }
 0x577   : > { %v1040_v19 = vpop.permute.xlu1 %1039 }
 0x578   : > { %1850 = vmatmul.mubr.msk.f32.gmra.mxu0 %vm368_vm2, %v1040_v19 }
 0x579   : > { %1869 = vmatprep.mubr.msk.f32.mxu0 %vm2107_vm0, %v2106_v0 }
 0x629   : > { %v1205_v22 = vpop.f32.mrf.mxu1 }
 0x62b   : > { %v1858_v23 = vpop.f32.mrf.mxu1 }
 0x62d   : > { %v1210_v24 = vpop.f32.mrf.mxu1 }
 0x62f   : > { %v1861_v25 = vpop.f32.mrf.mxu1 }
 0x630   : > { %v1113_v26 = vpop.f32.mrf.mxu0 }
 0x631   : > { %v1206_v27 = vadd.f32 %v1205_v22, %v1113_v26  ;;  %v1215_v28 = vpop.f32.mrf.mxu1 }
 0x632   : > { %v1845_v29 = vpop.f32.mrf.mxu0 }
 0x633   : > { %v1688_v30 = vmul.f32 -1.442695, %v1206_v27  ;;  %v1864_v31 = vpop.f32.mrf.mxu1 }
 0x634   : > { %v1118_v32 = vpop.f32.mrf.mxu0 }
 0x635   : > { %1989 = vpow2.f32 %v1688_v30  ;;  %v1211_v33 = vadd.f32 %v1210_v24, %v1118_v32 }
 0x636   : > { %v1848_v34 = vpop.f32.mrf.mxu0 }
 0x637   : > { %v1689_v35 = vmul.f32 -1.442695, %v1211_v33 }
 0x638   : > { %v1123_v36 = vpop.f32.mrf.mxu0 }
 0x639   : > { %1991 = vpow2.f32 %v1689_v35  ;;  %v1216_v37 = vadd.f32 %v1215_v28, %v1123_v36 }
 0x63a   : > { %v1851_v38 = vpop.f32.mrf.mxu0 }
 0x63b   : > { %v1690_v39 = vmul.f32 -1.442695, %v1216_v37 }
 0x63d   : > { %1993 = vpow2.f32 %v1690_v39 }
 0x642   : > { %v1990_v40 = vpop.eup %1989 }
 0x643   : > { %v1231_v41 = vadd.f32 1.0, %v1990_v40 }
 0x645   : > { %1995 = vrcp.f32 %v1231_v41 }
 0x646   : > { %v1992_v42 = vpop.eup %1991 }
 0x647   : > { %v1232_v43 = vadd.f32 1.0, %v1992_v42 }
 0x649   : > { %1997 = vrcp.f32 %v1232_v43 }
 0x64a   : > { %v1994_v44 = vpop.eup %1993 }
 0x64b   : > { %v1233_v45 = vadd.f32 1.0, %v1994_v44 }
 0x64d   : > { %1999 = vrcp.f32 %v1233_v45 }
 0x64e   : > { %2001 = vtanh.f32 %v1206_v27  ;;  %v1698_v27 = vld [vmem:[%s2476_s7] ss:$0 sm:$0xff] }
 0x64f   : > { %2003 = vtanh.f32 %v1211_v33 }
 0x650   : > { %2005 = vtanh.f32 %v1216_v37 }
 0x652   : > { %v1996_v48 = vpop.eup %1995 }
 0x653   : > { %1243 = vrot.lane.b32.xlu1 %v1996_v48, %s2108_s14 }
 0x656   : > { %v1998_v49 = vpop.eup %1997 }
 0x657   : > { %1245 = vrot.lane.b32.xlu0 %v1998_v49, %s2108_s14 }
 0x65a   : > { %v2000_v50 = vpop.eup %1999 }
 0x65b   : > { %1247 = vrot.lane.b32.xlu1 %v2000_v50, %s2108_s14  ;;  %v2002_v51 = vpop.eup %2001 }
 0x65c   : > { %v2004_v54 = vpop.eup %2003 }
 0x65d   : > { %v2006_v59 = vpop.eup %2005 }
 0x6c5   : > { %v1244_v52 = vpop.permute.xlu1 %1243 }
 0x6c6   : > { %v1252_v53 = vmul.f32 %v2002_v51, %v1244_v52 }
 0x6c8   : > { %1870 = vmatmul.mubr.msk.f32.vlgmr.msra.gmra.mxu0 %vm368_vm2, %v1252_v53 }
 0x6c9   : > { %v1246_v55 = vpop.permute.xlu0 %1245  ;;  %1872 = vmatprep.mubr.msk.f32.mxu0 %vm2107_vm0, %v2106_v0  ;;  %1892 = vmatpush3.msra.mxu0 %v1455_v2 }
 0x6ca   : > { %v1253_v56 = vmul.f32 %v2004_v54, %v1246_v55  ;;  %1893 = vmatprep.subr.mxu0 %v2106_v0 }
 0x6cb   : > { %1894 = vmatpush3.msra.mxu0 %v1454_v6 }
 0x6cc   : > { %1873 = vmatmul.mubr.msk.f32.gmra.mxu0 %vm368_vm2, %v1253_v56 }
 0x6cd   : > { %v1248_v60 = vpop.permute.xlu1 %1247  ;;  %1875 = vmatprep.mubr.msk.f32.mxu0 %vm2107_vm0, %v2106_v0 }
 0x6ce   : > { %v1254_v1 = vmul.f32 %v2006_v59, %v1248_v60 }
 0x6d0   : > { %1876 = vmatmul.mubr.msk.f32.gmra.mxu0 %vm368_vm2, %v1254_v1 }
 0x6d1   : > { %1895 = vmatprep.mubr.msk.f32.mxu0 %vm2107_vm0, %v2106_v0 }
 0x788   : > { %v1333_v8 = vpop.f32.mrf.mxu0 }
 0x789   : > { %v1347_v9 = vadd.f32 %v1333_v8, %v1011_v7 }
 0x78a   : > { %v1871_v11 = vpop.f32.mrf.mxu0 }
 0x78b   : > { %v1350_v12 = vmax.f32 %v1347_v9, 0.0 }
 0x78c   : > { %v1338_v13 = vpop.f32.mrf.mxu0 }
 0x78d   : > { %v1348_v14 = vadd.f32 %v1338_v13, %v1012_v58  ;;  %1883 = vmatmul.mubr.msk.f32.vlgmr.msra.gmra.mxu1 %vm368_vm2, %v1350_v12 }
 0x78e   : > { %v1874_v62 = vpop.f32.mrf.mxu0  ;;  %1885 = vmatprep.mubr.msk.f32.mxu1 %vm2107_vm0, %v2106_v0 }
 0x78f   : > { %v1351_v5 = vmax.f32 %v1348_v14, 0.0 }
 0x790   : > { %v1343_v57 = vpop.f32.mrf.mxu0 }
 0x791   : > { %v1349_v63 = vadd.f32 %v1343_v57, %v1013_v15  ;;  %1886 = vmatmul.mubr.msk.f32.gmra.mxu1 %vm368_vm2, %v1351_v5 }
 0x792   : > { %v1877_v16 = vpop.f32.mrf.mxu0  ;;  %1888 = vmatprep.mubr.msk.f32.mxu1 %vm2107_vm0, %v2106_v0 }
 0x793   : > { %v1352_v61 = vmax.f32 %v1349_v63, 0.0 }
 0x795   : > { %1889 = vmatmul.mubr.msk.f32.gmra.mxu1 %vm368_vm2, %v1352_v61 }
 0x84d   : > { %v1437_v17 = vpop.f32.mrf.mxu1 }
 0x84e   : > { %v1438_v18 = vadd.f32 %v1694_v3, %v1437_v17 }
 0x84f   : > { %v1884_v19 = vpop.f32.mrf.mxu1 }
 0x850   : > { %v1451_v4 = vmax.f32 %v1438_v18, 0.0 }
 0x851   : > { %v1442_v10 = vpop.f32.mrf.mxu1 }
 0x852   : > { %v1443_v20 = vadd.f32 %v1694_v3, %v1442_v10  ;;  %1896 = vmatmul.mubr.msk.f32.vlgmr.msra.gmra.mxu0 %vm368_vm2, %v1451_v4 }
 0x853   : > { %v1887_v21 = vpop.f32.mrf.mxu1  ;;  %1898 = vmatprep.mubr.msk.f32.mxu0 %vm2107_vm0, %v2106_v0 }
 0x854   : > { %v1452_v22 = vmax.f32 %v1443_v20, 0.0 }
 0x855   : > { %v1447_v23 = vpop.f32.mrf.mxu1 }
 0x856   : > { %v1448_v24 = vadd.f32 %v1694_v3, %v1447_v23  ;;  %1899 = vmatmul.mubr.msk.f32.gmra.mxu0 %vm368_vm2, %v1452_v22 }
 0x857   : > { %v1890_v25 = vpop.f32.mrf.mxu1  ;;  %1901 = vmatprep.mubr.msk.f32.mxu0 %vm2107_vm0, %v2106_v0 }
 0x858   : > { %v1453_v26 = vmax.f32 %v1448_v24, 0.0 }
 0x85a   : > { %1902 = vmatmul.mubr.msk.f32.gmra.mxu0 %vm368_vm2, %v1453_v26 }
 0x912   : > { %v1538_v28 = vpop.f32.mrf.mxu0 }
 0x913   : > { %v1539_v29 = vadd.f32 %v1698_v27, %v1538_v28 }
 0x914   : > { %v1897_v30 = vpop.f32.mrf.mxu0 }
 0x915   : > { %1551 = vst.msk [vmem:[%s349_s15] sm:$0xff] %vm368_vm2, %v1539_v29 }
 0x916   : > { %v1543_v31 = vpop.f32.mrf.mxu0 }
 0x917   : > { %v1544_v0 = vadd.f32 %v1698_v27, %v1543_v31 }
 0x918   : > { %v1900_v32 = vpop.f32.mrf.mxu0 }
 0x919   : > { %1553 = vst.msk [vmem:[%s349_s15 + $0x8] sm:$0x7f] %vm1552_vm5, %v1544_v0 }
 0x91a   : > { %v1548_v33 = vpop.f32.mrf.mxu0 }
 0x91c   : > { %v1903_v34 = vpop.f32.mrf.mxu0 }
 0x91d PF: > { %s20_s27 = sadd.s32 1, %s2099_s27  }
 0x91e   : > { %p17_p2 = scmp.ge.s32.totalorder %s20_s27, 4  }
 0x920   :  { %19 = sbr.rel (!%p17_p2) target bundleno = 2 (0x2), region = 101 }
 0x925   :  { %1575 = vsyncpa [#allocation3], 1 }
 0x926   :  { %1577 = vsyncpa [#allocation3 + $0x1], 1 }
 0x927   :  { %1578 = vsyncpa [#allocation5], 1 }

</bundles_post_ra>
